<compile_context>
chip_gen: v6e
topology: v6e:2x2x1
jax: 0.10.0
libtpu: 0.0.40
codegen_flags: <defaults>
</compile_context>

<pallas_src>
import functools

import jax
import jax.numpy as jnp
from jax.experimental import pallas as pl
from jax.experimental.pallas import tpu as pltpu

LANE = 128
MXU_DTYPE = jnp.bfloat16  # MXU-operand dtype; all accumulation stays f32.


def _round_up(v, m):
    return ((v + m - 1) // m) * m


def _pad2(x, shape):
    return jnp.pad(x, [(0, s - d) for s, d in zip(shape, x.shape)])


# ----------------------------------------------------------------------------
# Fused 2-layer SAGENet kernel
# ----------------------------------------------------------------------------
def _sage_layer(a, x, w_ref, b_ref, *, agg_first, in_pad, out_pad):
    """out = (A @ x) @ Wl + x @ Wr + b  (bf16 MXU operands, f32 accumulate)."""
    if agg_first:
        # w_ref = [Wl ; Wr] stacked on the input axis: (2*in_pad, out_pad).
        # Two dots against static slices of the merged weight -- no
        # concatenate, no extra VMEM materialization before the weight matmul.
        agg = jnp.dot(a, x, preferred_element_type=jnp.float32).astype(x.dtype)
        out = (jnp.dot(agg, w_ref[pl.ds(0, in_pad), :],
                       preferred_element_type=jnp.float32)
               + jnp.dot(x, w_ref[pl.ds(in_pad, in_pad), :],
                         preferred_element_type=jnp.float32))
    else:
        # w_ref = [Wl | Wr] on the output axis: (in_pad, 2*out_pad).
        z = jnp.dot(x, w_ref[...], preferred_element_type=jnp.float32)
        z_l = z[:, :out_pad].astype(x.dtype)
        out = jnp.dot(a, z_l, preferred_element_type=jnp.float32) + z[:, out_pad:]
    return out + b_ref[...]  # bias is (1, out_pad) f32, broadcasts over rows


def sagenet_fused_kernel(a_ref, x_ref, w1_ref, b1_ref, w2_ref, b2_ref, o_ref,
                         *, agg_first_1, agg_first_2, in_pad, hid_pad, out_pad):
    a = a_ref[...]                          # bf16 mean adjacency
    # Layer 1 + fused ReLU. `h` never leaves VMEM (no HBM round-trip).
    h = _sage_layer(a, x_ref[...], w1_ref, b1_ref,
                    agg_first=agg_first_1, in_pad=in_pad, out_pad=hid_pad)
    h = jnp.maximum(h, 0.0)                 # ReLU on the f32 accumulator (VPU)
    # dropout(p=0) is the identity.
    h = h.astype(MXU_DTYPE)                 # bf16 only for the MXU operands
    out = _sage_layer(a, h, w2_ref, b2_ref,
                      agg_first=agg_first_2, in_pad=hid_pad, out_pad=out_pad)
    o_ref[...] = out.astype(o_ref.dtype)


# ----------------------------------------------------------------------------
# Glue (plain JAX): adjacency / weight packing hoisted out of the forward path.
# ----------------------------------------------------------------------------
def build_mean_adjacency(edge_index, num_nodes):
    src, dst = edge_index[0], edge_index[1]
    a = jnp.zeros((num_nodes, num_nodes), jnp.float32)
    # message flows src -> dst; aggregate incoming edges at each destination
    a = a.at[dst, src].add(1.0)
    deg = a.sum(axis=1, keepdims=True)
    return jnp.where(deg > 0, a / jnp.maximum(deg, 1.0), 0.0)


def preprocess_graph(edge_index, num_nodes):
    """Once per graph: padded, bf16 mean adjacency (hoisted out of forward)."""
    # TODO(synk): for non-toy graphs, replace the dense N x N adjacency with a
    # CSR / padded-neighbor-list fed via PrefetchScalarGridSpec and a tiled
    # grid ('parallel' row axis for v7x megacore, 'arbitrary' N-reduction last,
    # 256-wide tiles on v6e/v7x, f32 VMEM accumulator in scratch_shapes).
    n_p = _round_up(num_nodes, LANE)
    a = build_mean_adjacency(edge_index, num_nodes)
    return _pad2(a, (n_p, n_p)).astype(MXU_DTYPE)


def _merge_layer_weights(w_l, w_r, b, in_pad, out_pad, agg_first):
    wl = _pad2(w_l, (in_pad, out_pad))
    wr = _pad2(w_r, (in_pad, out_pad))
    w = jnp.concatenate([wl, wr], axis=0 if agg_first else 1)
    return w.astype(MXU_DTYPE), _pad2(b.reshape(1, -1), (1, out_pad))


def pack_params(params):
    """Once at init: merged + padded + bf16 weights, f32 biases."""
    (w_l1, w_r1, b1), (w_l2, w_r2, b2) = params
    in_dim, hid_dim = w_l1.shape
    out_dim = w_l2.shape[1]
    in_p, hid_p, out_p = (_round_up(d, LANE) for d in (in_dim, hid_dim, out_dim))
    # A-contraction ordering decided on PADDED widths: contract the N x N
    # adjacency at min(F_in_pad, F_out_pad).
    agg_first_1 = in_p <= hid_p
    agg_first_2 = hid_p <= out_p
    w1, b1_p = _merge_layer_weights(w_l1, w_r1, b1, in_p, hid_p, agg_first_1)
    w2, b2_p = _merge_layer_weights(w_l2, w_r2, b2, hid_p, out_p, agg_first_2)
    return dict(w1=w1, b1=b1_p, w2=w2, b2=b2_p,
                dims=(in_dim, hid_dim, out_dim),
                pads=(in_p, hid_p, out_p),
                agg_first=(agg_first_1, agg_first_2))


def _layer_flops(n_p, f_in, f_out, agg_first):
    if agg_first:
        return 2 * n_p * n_p * f_in + 2 * n_p * (2 * f_in) * f_out
    return 2 * n_p * f_in * (2 * f_out) + 2 * n_p * n_p * f_out


def sagenet_forward(packed, a_pad, x):
    n, _ = x.shape
    in_p, hid_p, out_p = packed["pads"]
    out_dim = packed["dims"][2]
    agg1, agg2 = packed["agg_first"]
    n_p = a_pad.shape[0]

    x_p = _pad2(x, (n_p, in_p)).astype(MXU_DTYPE)
    operands = (a_pad, x_p, packed["w1"], packed["b1"], packed["w2"], packed["b2"])

    in_bytes = sum(int(o.nbytes) for o in operands)
    out_bytes = n_p * out_p * 4
    flops = (_layer_flops(n_p, in_p, hid_p, agg1)
             + _layer_flops(n_p, hid_p, out_p, agg2))
    # Whole-array grid-less call: operands + output + a few f32 intermediates.
    scratch_guess = 8 * n_p * max(in_p, hid_p, out_p) * 4
    vmem_limit = min(120 << 20,
                     max(8 << 20, 2 * (in_bytes + out_bytes + scratch_guess)))

    kernel = functools.partial(
        sagenet_fused_kernel, agg_first_1=agg1, agg_first_2=agg2,
        in_pad=in_p, hid_pad=hid_p, out_pad=out_p)

    vmem = pl.BlockSpec(memory_space=pltpu.MemorySpace.VMEM)
    out_padded = pl.pallas_call(
        kernel,
        out_shape=jax.ShapeDtypeStruct((n_p, out_p), jnp.float32),
        in_specs=[vmem] * 6,
        out_specs=vmem,
        compiler_params=pltpu.CompilerParams(vmem_limit_bytes=int(vmem_limit)),
        cost_estimate=pl.CostEstimate(flops=int(flops), transcendentals=0,
                                      bytes_accessed=int(in_bytes + out_bytes)),
    )(*operands)
    return out_padded[:n, :out_dim]


# ----------------------------------------------------------------------------
# Init + pure-JAX references
# ----------------------------------------------------------------------------
def init_sage_conv_params(key, in_dim, out_dim):
    k1, k2, k3 = jax.random.split(key, 3)
    scale = 1.0 / jnp.sqrt(jnp.float32(in_dim))
    # stored already transposed: (in_dim, out_dim), so kernels do x @ W
    w_l = jax.random.uniform(k1, (in_dim, out_dim), jnp.float32, -scale, scale)
    w_r = jax.random.uniform(k2, (in_dim, out_dim), jnp.float32, -scale, scale)
    b_l = jax.random.uniform(k3, (out_dim,), jnp.float32, -scale, scale)
    return w_l, w_r, b_l


def sagenet_reference(params, x, edge_index, *, mxu_dtype=None):
    """Pure-JAX reference. mxu_dtype=None -> exact module semantics (all f32);
    mxu_dtype=bf16 -> mirrors the kernel's bf16-operand / f32-accumulate dots."""
    (w_l1, w_r1, b1), (w_l2, w_r2, b2) = params
    a = build_mean_adjacency(edge_index, x.shape[0])

    def dot(p, q):
        if mxu_dtype is not None:
            p, q = p.astype(mxu_dtype), q.astype(mxu_dtype)
        return jnp.dot(p, q, preferred_element_type=jnp.float32)

    def conv(a, x, wl, wr, b):
        return dot(dot(a, x), wl) + dot(x, wr) + b[None, :]

    h = jnp.maximum(conv(a, x, w_l1, w_r1, b1), 0.0)
    return conv(a, h, w_l2, w_r2, b2)


if __name__ == "__main__":
    N, E = 16, 40                     # nodes, edges
    IN_DIM, HIDDEN_DIM, OUT_DIM = 8, 32, 8

    key = jax.random.PRNGKey(0)
    k_x, k_e, k_p1, k_p2 = jax.random.split(key, 4)

    x = jax.random.normal(k_x, (N, IN_DIM), jnp.float32)
    edge_index = jax.random.randint(k_e, (2, E), 0, N, jnp.int32)

    params = (
        init_sage_conv_params(k_p1, IN_DIM, HIDDEN_DIM),
        init_sage_conv_params(k_p2, HIDDEN_DIM, OUT_DIM),
    )

    packed = pack_params(params)             # hoisted: once at init
    a_pad = preprocess_graph(edge_index, N)  # hoisted: once per graph

    out = jax.block_until_ready(sagenet_forward(packed, a_pad, x))
    assert out.shape == (N, OUT_DIM)

    # Tight check vs. a reference mirroring the kernel's bf16-MXU / f32-acc regime.
    ref_bf16 = sagenet_reference(params, x, edge_index, mxu_dtype=MXU_DTYPE)
    assert jnp.allclose(out, ref_bf16, atol=2e-2, rtol=2e-2), \
        float(jnp.max(jnp.abs(out - ref_bf16)))

    # Loose check vs. exact f32 module semantics (bf16 operand rounding only).
    ref_f32 = sagenet_reference(params, x, edge_index)
    assert jnp.allclose(out, ref_f32, atol=1.5e-1, rtol=1e-1), \
        float(jnp.max(jnp.abs(out - ref_f32)))

    print("KERNEL_OK")
</pallas_src>

<mosaic_0001>
module attributes {stable_mosaic.version = 11 : i64} {
  func.func @sagenet_fused_kernel(%arg0: memref<128x128xbf16, #tpu.memory_space<vmem>>, %arg1: memref<128x128xbf16, #tpu.memory_space<vmem>>, %arg2: memref<256x128xbf16, #tpu.memory_space<vmem>>, %arg3: memref<1x128xf32, #tpu.memory_space<vmem>>, %arg4: memref<256x128xbf16, #tpu.memory_space<vmem>>, %arg5: memref<1x128xf32, #tpu.memory_space<vmem>>, %arg6: memref<128x128xf32, #tpu.memory_space<vmem>>) attributes {dimension_semantics = [], scalar_prefetch = 0 : i64, scratch_operands = 0 : i64, tpu.core_type = #tpu.core_type<tc>} {
    %c0 = arith.constant 0 : index
    %c0_0 = arith.constant 0 : index
    %0 = vector.load %arg0[%c0, %c0_0] : memref<128x128xbf16, #tpu.memory_space<vmem>>, vector<128x128xbf16>
    %c0_1 = arith.constant 0 : index
    %c0_2 = arith.constant 0 : index
    %1 = vector.load %arg1[%c0_1, %c0_2] : memref<128x128xbf16, #tpu.memory_space<vmem>>, vector<128x128xbf16>
    %cst = arith.constant dense<0.000000e+00> : vector<128x128xf32>
    %2 = tpu.matmul %0, %1, %cst {dimension_numbers = #tpu.dot_dimension_numbers<[1], [0], [0], [1], [0, 0, 1, 1], [], []>} : vector<128x128xbf16>, vector<128x128xbf16>, vector<128x128xf32> -> vector<128x128xf32>
    %3 = arith.truncf %2 : vector<128x128xf32> to vector<128x128xbf16>
    %c0_3 = arith.constant 0 : index
    %c0_4 = arith.constant 0 : index
    %4 = vector.load %arg2[%c0_3, %c0_4] : memref<256x128xbf16, #tpu.memory_space<vmem>>, vector<128x128xbf16>
    %cst_5 = arith.constant dense<0.000000e+00> : vector<128x128xf32>
    %5 = tpu.matmul %3, %4, %cst_5 {dimension_numbers = #tpu.dot_dimension_numbers<[1], [0], [0], [1], [0, 0, 1, 1], [], []>} : vector<128x128xbf16>, vector<128x128xbf16>, vector<128x128xf32> -> vector<128x128xf32>
    %c128 = arith.constant 128 : index
    %c0_6 = arith.constant 0 : index
    %6 = vector.load %arg2[%c128, %c0_6] : memref<256x128xbf16, #tpu.memory_space<vmem>>, vector<128x128xbf16>
    %cst_7 = arith.constant dense<0.000000e+00> : vector<128x128xf32>
    %7 = tpu.matmul %1, %6, %cst_7 {dimension_numbers = #tpu.dot_dimension_numbers<[1], [0], [0], [1], [0, 0, 1, 1], [], []>} : vector<128x128xbf16>, vector<128x128xbf16>, vector<128x128xf32> -> vector<128x128xf32>
    %8 = arith.addf %5, %7 : vector<128x128xf32>
    %c0_8 = arith.constant 0 : index
    %c0_9 = arith.constant 0 : index
    %9 = vector.load %arg3[%c0_8, %c0_9] : memref<1x128xf32, #tpu.memory_space<vmem>>, vector<1x128xf32>
    %10 = vector.broadcast %9 : vector<1x128xf32> to vector<128x128xf32>
    %11 = arith.addf %8, %10 : vector<128x128xf32>
    %cst_10 = arith.constant 0.000000e+00 : f32
    %12 = vector.broadcast %cst_10 : f32 to vector<128x128xf32>
    %13 = arith.maximumf %11, %12 : vector<128x128xf32>
    %14 = arith.truncf %13 : vector<128x128xf32> to vector<128x128xbf16>
    %cst_11 = arith.constant dense<0.000000e+00> : vector<128x128xf32>
    %15 = tpu.matmul %0, %14, %cst_11 {dimension_numbers = #tpu.dot_dimension_numbers<[1], [0], [0], [1], [0, 0, 1, 1], [], []>} : vector<128x128xbf16>, vector<128x128xbf16>, vector<128x128xf32> -> vector<128x128xf32>
    %16 = arith.truncf %15 : vector<128x128xf32> to vector<128x128xbf16>
    %c0_12 = arith.constant 0 : index
    %c0_13 = arith.constant 0 : index
    %17 = vector.load %arg4[%c0_12, %c0_13] : memref<256x128xbf16, #tpu.memory_space<vmem>>, vector<128x128xbf16>
    %cst_14 = arith.constant dense<0.000000e+00> : vector<128x128xf32>
    %18 = tpu.matmul %16, %17, %cst_14 {dimension_numbers = #tpu.dot_dimension_numbers<[1], [0], [0], [1], [0, 0, 1, 1], [], []>} : vector<128x128xbf16>, vector<128x128xbf16>, vector<128x128xf32> -> vector<128x128xf32>
    %c128_15 = arith.constant 128 : index
    %c0_16 = arith.constant 0 : index
    %19 = vector.load %arg4[%c128_15, %c0_16] : memref<256x128xbf16, #tpu.memory_space<vmem>>, vector<128x128xbf16>
    %cst_17 = arith.constant dense<0.000000e+00> : vector<128x128xf32>
    %20 = tpu.matmul %14, %19, %cst_17 {dimension_numbers = #tpu.dot_dimension_numbers<[1], [0], [0], [1], [0, 0, 1, 1], [], []>} : vector<128x128xbf16>, vector<128x128xbf16>, vector<128x128xf32> -> vector<128x128xf32>
    %21 = arith.addf %18, %20 : vector<128x128xf32>
    %c0_18 = arith.constant 0 : index
    %c0_19 = arith.constant 0 : index
    %22 = vector.load %arg5[%c0_18, %c0_19] : memref<1x128xf32, #tpu.memory_space<vmem>>, vector<1x128xf32>
    %23 = vector.broadcast %22 : vector<1x128xf32> to vector<128x128xf32>
    %24 = arith.addf %21, %23 : vector<128x128xf32>
    %c0_20 = arith.constant 0 : index
    %c0_21 = arith.constant 0 : index
    %25 = vector.load %arg6[%c0_20, %c0_21] : memref<128x128xf32, #tpu.memory_space<vmem>>, vector<128x128xf32>
    tpu.vector_store %arg6[%c0_20, %c0_21], %24 {strides = array<i32>} : memref<128x128xf32, #tpu.memory_space<vmem>>, vector<128x128xf32>,
    return
  }
}

</mosaic_0001>

<bundles_post_ra>
// kernel: tpu_custom_call.1
= control target key start
LH: loop header
LB: loop body
LE: loop exit
PB: predicated region body
PF: predicated region fallthrough
CT: control target
= control target key end

     0   :  { %11 = vsyncpa [#allocation3], 0  ;;  %s1855_s0 = inlined_call_operand.hbm [shape: bf16[128,128], index: 0, kind: input, shape index: {}]   ;;  %s1856_s1 = inlined_call_operand.hbm [shape: bf16[128,128], index: 1, kind: input, shape index: {}]   ;;  %s1857_s2 = inlined_call_operand.hbm [shape: bf16[256,128], index: 2, kind: input, shape index: {}]   ;;  %s1858_s3 = inlined_call_operand.vmem [shape: f32[1,128], index: 3, kind: input, shape index: {}]   ;;  %s1859_s4 = inlined_call_operand.hbm [shape: bf16[256,128], index: 4, kind: input, shape index: {}]   ;;  %s1860_s5 = inlined_call_operand.vmem [shape: f32[1,128], index: 5, kind: input, shape index: {}]   ;;  %s1861_s6 = inlined_call_operand.hbm [shape: f32[128,128], index: 6, kind: output, shape index: {}]  }
   0x1   :  { %12 = vsyncpa [#allocation6], 0 }
   0x2   :  { %13 = vsyncpa [#allocation9], 0 }
   0x3   :  { %14 = vsyncpa [#allocation4], 0  ;;  %s1670_s21 = smov [#allocation5]   ;;  %s1671_s23 = smov [#allocation2]  }
   0x4   :  { %s32_s22 = sshll.u32 %s1670_s21, 4  ;;  %s20_s24 = sshll.u32 %s1671_s23, 4  ;;  %s33_s22 = int_to_ptr.vmem [resolvable:$true] %s32_s22  ;;  %s21_s24 = int_to_ptr.vmem [resolvable:$true] %s20_s24 }
   0x5   :  { %s1570_s25 = scalar_lea.vmem %s33_s22, 1024  ;;  %p1575_p1 = scmp.lt.s32.totalorder %s33_s22, %s33_s22 }
   0x6   :  { %p1571_p0 = scmp.ne.s32.totalorder %s33_s22, %s1570_s25  ;;  %p1576_p2 = scmp.lt.s32.totalorder %s1570_s25, %s1570_s25 }
   0x8   :  { %p1577_p3 = por %p1576_p2, %p1575_p1 }
   0xa   :  { %p1578_p4 = pnand %p1577_p3, %p1571_p0 }
   0xc   :  { %1581 = shalt.err (!%p1578_p4)
}
   0xd   :  { %s1672_s26 = smov 64   ;;  %s1673_s27 = smov 4  }
   0xe   :  { %38 = dma.hbm_to_vmem [thread:$0]  %s1856_s1, 1024, %s33_s22, [#allocation6], %s1672_s26, %s1672_s26, %s1673_s27  }
   0xf   :  { %s1590_s30 = scalar_lea.vmem %s21_s24, 1024  ;;  %p1595_p6 = scmp.lt.s32.totalorder %s21_s24, %s21_s24 }
  0x10   :  { %p1591_p5 = scmp.ne.s32.totalorder %s21_s24, %s1590_s30  ;;  %p1596_p7 = scmp.lt.s32.totalorder %s1590_s30, %s1590_s30 }
  0x12   :  { %p1597_p8 = por %p1596_p7, %p1595_p6 }
  0x14   :  { %p1598_p9 = pnand %p1597_p8, %p1591_p5 }
  0x16   :  { %1601 = shalt.err (!%p1598_p9)
}
  0x17   :  { %26 = dma.hbm_to_vmem [thread:$0]  %s1855_s0, 1024, %s21_s24, [#allocation3], %s1672_s26, %s1672_s26, %s1673_s27  }
  0x18   :  { %s1674_s9 = smov [#allocation7]   ;;  %s1675_s11 = smov [#allocation8]  }
  0x19   :  { %s44_s10 = sshll.u32 %s1674_s9, 4  ;;  %s58_s12 = sshll.u32 %s1675_s11, 4  ;;  %s45_s10 = int_to_ptr.vmem [resolvable:$true] %s44_s10  ;;  %s59_s12 = int_to_ptr.vmem [resolvable:$true] %s58_s12 }
  0x1a   :  { %s1610_s1 = scalar_lea.vmem %s45_s10, 2048  ;;  %p1615_p11 = scmp.lt.s32.totalorder %s45_s10, %s45_s10 }
  0x1b   :  { %p1611_p10 = scmp.ne.s32.totalorder %s45_s10, %s1610_s1  ;;  %p1616_p12 = scmp.lt.s32.totalorder %s1610_s1, %s1610_s1 }
  0x1d   :  { %p1617_p13 = por %p1616_p12, %p1615_p11 }
  0x1f   :  { %p1618_p0 = pnand %p1617_p13, %p1611_p10 }
  0x21   :  { %1621 = shalt.err (!%p1618_p0)
}
  0x22   :  { %50 = dma.hbm_to_vmem [thread:$0]  %s1857_s2, 2048, %s45_s10, [#allocation6], %s1672_s26, %s1672_s26, %s1673_s27  }
  0x23   :  { %s1630_s0 = scalar_lea.vmem %s59_s12, 2048  ;;  %p1635_p2 = scmp.lt.s32.totalorder %s59_s12, %s59_s12 }
  0x24   :  { %p1631_p1 = scmp.ne.s32.totalorder %s59_s12, %s1630_s0  ;;  %p1636_p3 = scmp.lt.s32.totalorder %s1630_s0, %s1630_s0 }
  0x26   :  { %p1637_p4 = por %p1636_p3, %p1635_p2 }
  0x28   :  { %p1638_p5 = pnand %p1637_p4, %p1631_p1 }
  0x2a   :  { %1641 = shalt.err (!%p1638_p5)
}
  0x2b   :  { %64 = dma.hbm_to_vmem [thread:$0]  %s1859_s4, 2048, %s59_s12, [#allocation9], %s1672_s26, %s1672_s26, %s1673_s27  }
  0x2c   :  { %1662 = dma.done.wait [#allocation3], 1024  }
  0x2d   :  { %1663 = vsyncadd [#allocation3], 4294966272 }
  0x2e   :  { %1664 = dma.done.wait [#allocation6], 3072  }
  0x2f   :  { %1665 = vsyncadd [#allocation6], 4294964224 }
  0x30   :  { %1666 = dma.done.wait [#allocation9], 2048  }
  0x31   :  { %1667 = vsyncadd [#allocation9], 4294965248  ;;  %v1738_v0 = vld [vmem:[#allocation5 + $0x38] sm:$0xff]   ;;  %v1740_v1 = vld [vmem:[#allocation5 + $0x30] sm:$0xff]  }
  0x32   :  { %1313 = vmatprep.subr.bf16.mxu0 %v1738_v0  ;;  %v1745_v2 = vld [vmem:[#allocation5 + $0x28] sm:$0xff]   ;;  %v1747_v3 = vld [vmem:[#allocation5 + $0x20] sm:$0xff]   ;;  %v1756_v6 = vld [vmem:[#allocation5 + $0x18] sm:$0xff]  }
  0x33   :  { %1314 = vmatpush3.bf16.msra.mxu0 %v1738_v0  ;;  %v1521_v4 = vld [vmem:[#allocation5] sm:$0xff]   ;;  %v1759_v7 = vld [vmem:[#allocation5 + $0x10] sm:$0xff]   ;;  %v1530_v8 = vld [vmem:[#allocation7 + $0x78] sm:$0xff]  }
  0x34   :  { %1315 = vmatprep.subr.bf16.mxu0 %v1740_v1  ;;  %v1751_v5 = vld [vmem:[#allocation2] sm:$0xff]   ;;  %1361 = vmatprep.mubr.bf16.mxu1 %v1521_v4  ;;  %v1531_v9 = vld [vmem:[#allocation7 + $0x70] sm:$0xff]   ;;  %v1520_v10 = vld [vmem:[#allocation5 + $0x8] sm:$0xff]  }
  0x35   :  { %1329 = vmatprep.mubr.bf16.mxu0 %v1751_v5  ;;  %1345 = vmatprep.subr.bf16.mxu1 %v1530_v8  ;;  %v1533_v11 = vld [vmem:[#allocation7 + $0x68] sm:$0xff]   ;;  %v1535_v12 = vld [vmem:[#allocation7 + $0x60] sm:$0xff]   ;;  %v1532_v13 = vld [vmem:[#allocation7 + $0x38] sm:$0xff]  }
  0x36   :  { %1346 = vmatpush3.bf16.msra.mxu1 %v1530_v8  ;;  %v1765_v14 = vld [vmem:[#allocation2 + $0x8] sm:$0xff]   ;;  %v1537_v15 = vld [vmem:[#allocation7 + $0x58] sm:$0xff]   ;;  %v1767_v16 = vld [vmem:[#allocation2 + $0x10] sm:$0xff]  }
  0x37   :  { %1316 = vmatpush3.bf16.msra.mxu0 %v1740_v1  ;;  %1347 = vmatprep.subr.bf16.mxu1 %v1531_v9  ;;  %v1534_v17 = vld [vmem:[#allocation7 + $0x30] sm:$0xff]   ;;  %v1536_v19 = vld [vmem:[#allocation7 + $0x28] sm:$0xff]   ;;  %v1771_v21 = vld [vmem:[#allocation2 + $0x18] sm:$0xff]  }
  0x38   :  { %1317 = vmatprep.subr.bf16.mxu0 %v1745_v2  ;;  %v1539_v18 = vld [vmem:[#allocation7 + $0x50] sm:$0xff]   ;;  %v1541_v20 = vld [vmem:[#allocation7 + $0x48] sm:$0xff]   ;;  %v1773_v22 = vld [vmem:[#allocation2 + $0x20] sm:$0xff]  }
  0x39   :  { %v1538_v23 = vld [vmem:[#allocation7 + $0x20] sm:$0xff]   ;;  %v1540_v24 = vld [vmem:[#allocation7 + $0x18] sm:$0xff]   ;;  %v1777_v25 = vld [vmem:[#allocation2 + $0x28] sm:$0xff]  }
  0x3a   :  { %1348 = vmatpush3.bf16.msra.mxu1 %v1531_v9  ;;  %v1779_v26 = vld [vmem:[#allocation2 + $0x30] sm:$0xff]   ;;  %v1783_v28 = vld [vmem:[#allocation2 + $0x38] sm:$0xff]   ;;  %v1543_v29 = vld [vmem:[#allocation7 + $0x40] sm:$0xff]  }
  0x3b   :  { %1318 = vmatpush3.bf16.msra.mxu0 %v1745_v2  ;;  %1349 = vmatprep.subr.bf16.mxu1 %v1533_v11  ;;  %v1542_v27 = vld [vmem:[#allocation7 + $0x10] sm:$0xff]   ;;  %v1544_v30 = vld [vmem:[#allocation7 + $0x8] sm:$0xff]   ;;  %v1545_v31 = vld [vmem:[#allocation7] sm:$0xff]  }
  0x3c   :  { %1319 = vmatprep.subr.bf16.mxu0 %v1747_v3  ;;  %v1546_v32 = vld [vmem:[#allocation8 + $0x78] sm:$0xff]   ;;  %v1547_v40 = vld [vmem:[#allocation8 + $0x70] sm:$0xff]   ;;  %v1548_v43 = vld [vmem:[#allocation8 + $0x68] sm:$0xff]  }
  0x3d   :  { %v1549_v48 = vld [vmem:[#allocation8 + $0x60] sm:$0xff]   ;;  %v1550_v60 = vld [vmem:[#allocation8 + $0x58] sm:$0xff]   ;;  %v1551_v61 = vld [vmem:[#allocation8 + $0x50] sm:$0xff]  }
  0x3e   :  { %1350 = vmatpush3.bf16.msra.mxu1 %v1533_v11  ;;  %v1552_v62 = vld [vmem:[#allocation8 + $0x48] sm:$0xff]   ;;  %v1553_v63 = vld [vmem:[#allocation8 + $0x40] sm:$0xff]  }
  0x3f   :  { %1320 = vmatpush3.bf16.msra.mxu0 %v1747_v3  ;;  %1351 = vmatprep.subr.bf16.mxu1 %v1535_v12 }
  0x40   :  { %1321 = vmatprep.subr.bf16.mxu0 %v1756_v6 }
  0x42   :  { %1352 = vmatpush3.bf16.msra.mxu1 %v1535_v12 }
  0x43   :  { %1322 = vmatpush3.bf16.msra.mxu0 %v1756_v6  ;;  %1353 = vmatprep.subr.bf16.mxu1 %v1537_v15 }
  0x44   :  { %1323 = vmatprep.subr.bf16.mxu0 %v1759_v7 }
  0x46   :  { %1354 = vmatpush3.bf16.msra.mxu1 %v1537_v15  ;;  %v1796_v15 = vld [vmem:[%s1858_s3] ss:$0 sm:$0xff] }
  0x47   :  { %1324 = vmatpush3.bf16.msra.mxu0 %v1759_v7  ;;  %1355 = vmatprep.subr.bf16.mxu1 %v1539_v18 }
  0x48   :  { %1325 = vmatprep.subr.bf16.mxu0 %v1520_v10 }
  0x4a   :  { %1356 = vmatpush3.bf16.msra.mxu1 %v1539_v18 }
  0x4b   :  { %1326 = vmatpush3.bf16.msra.mxu0 %v1520_v10  ;;  %1357 = vmatprep.subr.bf16.mxu1 %v1541_v20 }
  0x4c   :  { %1327 = vmatprep.subr.bf16.mxu0 %v1521_v4 }
  0x4e   :  { %1358 = vmatpush3.bf16.msra.mxu1 %v1541_v20 }
  0x4f   :  { %1328 = vmatpush3.bf16.msra.mxu0 %v1521_v4  ;;  %1359 = vmatprep.subr.bf16.mxu1 %v1543_v29 }
  0x50   :  { %1377 = vmatprep.subr.bf16.mxu0 %v1532_v13 }
  0x52   :  { %1330 = vmatmul.mubr.bf16.vlgmr.msra.gmra.mxu0 %v1765_v14  ;;  %1360 = vmatpush3.bf16.msra.mxu1 %v1543_v29 }
  0x53   :  { %1333 = vmatprep.mubr.bf16.mxu0 %v1767_v16  ;;  %1378 = vmatpush3.bf16.msra.mxu0 %v1532_v13 }
  0x54   :  { %1379 = vmatprep.subr.bf16.mxu0 %v1534_v17 }
  0x55   :  { %1362 = vmatmul.mubr.bf16.vlgmr.msra.gmra.mxu1 %v1520_v10 }
  0x56   :  { %1365 = vmatprep.mubr.bf16.mxu1 %v1759_v7 }
  0x57   :  { %1380 = vmatpush3.bf16.msra.mxu0 %v1534_v17 }
  0x58   :  { %1381 = vmatprep.subr.bf16.mxu0 %v1536_v19 }
  0x5a   :  { %1334 = vmatmul.mubr.bf16.gmra.mxu0 %v1771_v21 }
  0x5b   :  { %1337 = vmatprep.mubr.bf16.mxu0 %v1773_v22  ;;  %1382 = vmatpush3.bf16.msra.mxu0 %v1536_v19 }
  0x5c   :  { %1383 = vmatprep.subr.bf16.mxu0 %v1538_v23 }
  0x5d   :  { %1366 = vmatmul.mubr.bf16.gmra.mxu1 %v1756_v6 }
  0x5e   :  { %1369 = vmatprep.mubr.bf16.mxu1 %v1747_v3 }
  0x5f   :  { %1384 = vmatpush3.bf16.msra.mxu0 %v1538_v23 }
  0x60   :  { %1385 = vmatprep.subr.bf16.mxu0 %v1540_v24 }
  0x62   :  { %1338 = vmatmul.mubr.bf16.gmra.mxu0 %v1777_v25 }
  0x63   :  { %1341 = vmatprep.mubr.bf16.mxu0 %v1779_v26  ;;  %1386 = vmatpush3.bf16.msra.mxu0 %v1540_v24 }
  0x64   :  { %1387 = vmatprep.subr.bf16.mxu0 %v1542_v27 }
  0x65   :  { %1370 = vmatmul.mubr.bf16.gmra.mxu1 %v1745_v2 }
  0x66   :  { %1373 = vmatprep.mubr.bf16.mxu1 %v1740_v1 }
  0x67   :  { %1388 = vmatpush3.bf16.msra.mxu0 %v1542_v27 }
  0x68   :  { %1389 = vmatprep.subr.bf16.mxu0 %v1544_v30 }
  0x6a   :  { %1342 = vmatmul.mubr.bf16.gmra.mxu0 %v1783_v28 }
  0x6b   :  { %1390 = vmatpush3.bf16.msra.mxu0 %v1544_v30 }
  0x6c   :  { %1391 = vmatprep.subr.bf16.mxu0 %v1545_v31 }
  0x6d   :  { %1374 = vmatmul.mubr.bf16.gmra.mxu1 %v1738_v0 }
  0x6e   :  { %1425 = vmatprep.mubr.bf16.mxu1 %v1751_v5 }
  0x6f   :  { %1392 = vmatpush3.bf16.msra.mxu0 %v1545_v31 }
  0x70   :  { %1441 = vmatprep.subr.bf16.mxu0 %v1546_v32 }
 0x112   :  { %v1331_v33 = vpop.f32.mrf.mxu0 }
 0x114   :  { %v242_v34 = vpop.f32.mrf.mxu0 }
 0x115   :  { %v1363_v0 = vpop.f32.mrf.mxu1 }
 0x116   :  { %v1332_v35 = vpop.f32.mrf.mxu0 }
 0x117   :  { %v306_v38 = vpack.c.bf16 %v1332_v35, %v1331_v33  ;;  %v427_v1 = vpop.f32.mrf.mxu1 }
 0x118   :  { %v245_v36 = vpop.f32.mrf.mxu0 }
 0x119   :  { %v305_v37 = vpack.c.bf16 %v245_v36, %v242_v34  ;;  %v1364_v2 = vpop.f32.mrf.mxu1 }
 0x11a   :  { %v1335_v39 = vpop.f32.mrf.mxu0 }
 0x11b   :  { %1393 = vmatprep.mubr.bf16.mxu0 %v305_v37  ;;  %v430_v3 = vpop.f32.mrf.mxu1 }
 0x11c   :  { %v258_v41 = vpop.f32.mrf.mxu0  ;;  %1394 = vmatmul.mubr.bf16.vlgmr.msra.gmra.mxu0 %v306_v38 }
 0x11d   :  { %1442 = vmatpush3.bf16.msra.mxu0 %v1546_v32  ;;  %v1367_v4 = vpop.f32.mrf.mxu1 }
 0x11e   :  { %v1336_v42 = vpop.f32.mrf.mxu0  ;;  %1443 = vmatprep.subr.bf16.mxu0 %v1547_v40 }
 0x11f   :  { %v308_v46 = vpack.c.bf16 %v1336_v42, %v1335_v39  ;;  %v443_v5 = vpop.f32.mrf.mxu1 }
 0x120   :  { %v261_v44 = vpop.f32.mrf.mxu0 }
 0x121   :  { %v307_v45 = vpack.c.bf16 %v261_v44, %v258_v41  ;;  %1444 = vmatpush3.bf16.msra.mxu0 %v1547_v40  ;;  %v1368_v6 = vpop.f32.mrf.mxu1 }
 0x122   :  { %v1339_v47 = vpop.f32.mrf.mxu0  ;;  %1445 = vmatprep.subr.bf16.mxu0 %v1548_v43 }
 0x123   :  { %1397 = vmatprep.mubr.bf16.mxu0 %v307_v45  ;;  %v446_v7 = vpop.f32.mrf.mxu1 }
 0x124   :  { %v274_v49 = vpop.f32.mrf.mxu0  ;;  %1398 = vmatmul.mubr.bf16.gmra.mxu0 %v308_v46 }
 0x125   :  { %1446 = vmatpush3.bf16.msra.mxu0 %v1548_v43  ;;  %v1371_v10 = vpop.f32.mrf.mxu1 }
 0x126   :  { %v1340_v50 = vpop.f32.mrf.mxu0  ;;  %1447 = vmatprep.subr.bf16.mxu0 %v1549_v48 }
 0x127   :  { %v310_v53 = vpack.c.bf16 %v1340_v50, %v1339_v47  ;;  %v459_v19 = vpop.f32.mrf.mxu1 }
 0x128   :  { %v277_v51 = vpop.f32.mrf.mxu0 }
 0x129   :  { %v309_v52 = vpack.c.bf16 %v277_v51, %v274_v49  ;;  %1448 = vmatpush3.bf16.msra.mxu0 %v1549_v48  ;;  %v1372_v33 = vpop.f32.mrf.mxu1 }
 0x12a   :  { %v1343_v54 = vpop.f32.mrf.mxu0  ;;  %1449 = vmatprep.subr.bf16.mxu0 %v1550_v60 }
 0x12b   :  { %1401 = vmatprep.mubr.bf16.mxu0 %v309_v52  ;;  %v462_v44 = vpop.f32.mrf.mxu1 }
 0x12c   :  { %v290_v55 = vpop.f32.mrf.mxu0  ;;  %1402 = vmatmul.mubr.bf16.gmra.mxu0 %v310_v53 }
 0x12d   :  { %1450 = vmatpush3.bf16.msra.mxu0 %v1550_v60  ;;  %v1375_v52 = vpop.f32.mrf.mxu1 }
 0x12e   :  { %v1344_v56 = vpop.f32.mrf.mxu0  ;;  %1451 = vmatprep.subr.bf16.mxu0 %v1551_v61 }
 0x12f   :  { %v312_v59 = vpack.c.bf16 %v1344_v56, %v1343_v54 }
 0x130   :  { %v293_v57 = vpop.f32.mrf.mxu0 }
 0x131   :  { %v311_v58 = vpack.c.bf16 %v293_v57, %v290_v55  ;;  %1452 = vmatpush3.bf16.msra.mxu0 %v1551_v61 }
 0x132   :  { %1453 = vmatprep.subr.bf16.mxu0 %v1552_v62 }
 0x133   :  { %1405 = vmatprep.mubr.bf16.mxu0 %v311_v58 }
 0x134   :  { %1406 = vmatmul.mubr.bf16.gmra.mxu0 %v312_v59 }
 0x135   :  { %1454 = vmatpush3.bf16.msra.mxu0 %v1552_v62  ;;  %v475_v62 = vpop.f32.mrf.mxu1 }
 0x136   :  { %1455 = vmatprep.subr.bf16.mxu0 %v1553_v63 }
 0x139   :  { %1456 = vmatpush3.bf16.msra.mxu0 %v1553_v63 }
 0x1dc   :  { %v1395_v8 = vpop.f32.mrf.mxu0 }
 0x1dd   :  { %v581_v12 = vadd.f32 %v1395_v8, %v1363_v0 }
 0x1de   :  { %v572_v9 = vpop.f32.mrf.mxu0 }
 0x1df   :  { %v573_v11 = vadd.f32 %v572_v9, %v427_v1  ;;  %v644_v27 = vadd.f32 %v1796_v15, %v581_v12  ;;  %v1376_v9 = vpop.f32.mrf.mxu1 }
 0x1e0   :  { %v1396_v13 = vpop.f32.mrf.mxu0 }
 0x1e1   :  { %v584_v17 = vadd.f32 %v1396_v13, %v1364_v2  ;;  %v642_v20 = vadd.f32 %v1796_v15, %v573_v11  ;;  %v660_v37 = vmax.f32 %v644_v27, 0.0 }
 0x1e2   :  { %v575_v18 = vpop.f32.mrf.mxu0 }
 0x1e3   :  { %v645_v23 = vadd.f32 %v1796_v15, %v584_v17  ;;  %v576_v24 = vadd.f32 %v575_v18, %v430_v3  ;;  %v658_v34 = vmax.f32 %v642_v20, 0.0 }
 0x1e4   :  { %v1399_v29 = vpop.f32.mrf.mxu0 }
 0x1e5   :  { %v643_v30 = vadd.f32 %v1796_v15, %v576_v24  ;;  %v661_v31 = vmax.f32 %v645_v23, 0.0  ;;  %v597_v38 = vadd.f32 %v1399_v29, %v1367_v4  ;;  %v478_v24 = vpop.f32.mrf.mxu1 }
 0x1e6   :  { %v588_v32 = vpop.f32.mrf.mxu0 }
 0x1e7   :  { %v659_v35 = vmax.f32 %v643_v30, 0.0  ;;  %v589_v36 = vadd.f32 %v588_v32, %v443_v5  ;;  %v1804_v42 = vpack.c.bf16 %v661_v31, %v660_v37  ;;  %v648_v48 = vadd.f32 %v1796_v15, %v597_v38 }
 0x1e8   :  { %v1400_v39 = vpop.f32.mrf.mxu0 }
 0x1e9   :  { %v600_v40 = vadd.f32 %v1400_v39, %v1368_v6  ;;  %v1802_v41 = vpack.c.bf16 %v659_v35, %v658_v34  ;;  %v646_v45 = vadd.f32 %v1796_v15, %v589_v36  ;;  %v664_v57 = vmax.f32 %v648_v48, 0.0 }
 0x1ea   :  { %v591_v43 = vpop.f32.mrf.mxu0 }
 0x1eb   :  { %v649_v46 = vadd.f32 %v1796_v15, %v600_v40  ;;  %v592_v47 = vadd.f32 %v591_v43, %v446_v7  ;;  %1457 = vmatprep.mubr.bf16.mxu0 %v1802_v41  ;;  %v662_v54 = vmax.f32 %v646_v45, 0.0  ;;  %v1555_v40 = vld [vmem:[#allocation8 + $0x30] sm:$0xff]  }
 0x1ec   :  { %v1403_v49 = vpop.f32.mrf.mxu0  ;;  %1458 = vmatmul.mubr.bf16.vlgmr.msra.gmra.mxu0 %v1804_v42 }
 0x1ed   :  { %v647_v50 = vadd.f32 %v1796_v15, %v592_v47  ;;  %v665_v51 = vmax.f32 %v649_v46, 0.0  ;;  %v613_v58 = vadd.f32 %v1403_v49, %v1371_v10 }
 0x1ee   :  { %v604_v53 = vpop.f32.mrf.mxu0 }
 0x1ef   :  { %v663_v55 = vmax.f32 %v647_v50, 0.0  ;;  %v605_v56 = vadd.f32 %v604_v53, %v459_v19  ;;  %v677_v0 = vpack.c.bf16 %v665_v51, %v664_v57  ;;  %v652_v4 = vadd.f32 %v1796_v15, %v613_v58 }
 0x1f0   :  { %v1404_v59 = vpop.f32.mrf.mxu0 }
 0x1f1   :  { %v616_v60 = vadd.f32 %v1404_v59, %v1372_v33  ;;  %v676_v61 = vpack.c.bf16 %v663_v55, %v662_v54  ;;  %v650_v1 = vadd.f32 %v1796_v15, %v605_v56  ;;  %v668_v17 = vmax.f32 %v652_v4, 0.0 }
 0x1f2   :  { %v607_v63 = vpop.f32.mrf.mxu0 }
 0x1f3   :  { %v653_v2 = vadd.f32 %v1796_v15, %v616_v60  ;;  %v608_v3 = vadd.f32 %v607_v63, %v462_v44  ;;  %1461 = vmatprep.mubr.bf16.mxu0 %v676_v61  ;;  %v666_v11 = vmax.f32 %v650_v1, 0.0 }
 0x1f4   :  { %v1407_v5 = vpop.f32.mrf.mxu0  ;;  %1462 = vmatmul.mubr.bf16.gmra.mxu0 %v677_v0 }
 0x1f5   :  { %v651_v6 = vadd.f32 %v1796_v15, %v608_v3  ;;  %v629_v7 = vadd.f32 %v1407_v5, %v1375_v52  ;;  %v669_v8 = vmax.f32 %v653_v2, 0.0 }
 0x1f6   :  { %v620_v10 = vpop.f32.mrf.mxu0 }
 0x1f7   :  { %v667_v12 = vmax.f32 %v651_v6, 0.0  ;;  %v621_v13 = vadd.f32 %v620_v10, %v475_v62  ;;  %v656_v19 = vadd.f32 %v1796_v15, %v629_v7  ;;  %v679_v29 = vpack.c.bf16 %v669_v8, %v668_v17 }
 0x1f8   :  { %v1408_v18 = vpop.f32.mrf.mxu0 }
 0x1f9   :  { %v632_v20 = vadd.f32 %v1408_v18, %v1376_v9  ;;  %v678_v23 = vpack.c.bf16 %v667_v12, %v666_v11  ;;  %v654_v30 = vadd.f32 %v1796_v15, %v621_v13  ;;  %v672_v33 = vmax.f32 %v656_v19, 0.0  ;;  %v1834_v9 = vld [vmem:[%s1860_s5] ss:$0 sm:$0xff]  ;;  %s1676_s5 = smov [#allocation10]  }
 0x1fa   :  { %v623_v27 = vpop.f32.mrf.mxu0  ;;  %s1153_s18 = sshll.u32 %s1676_s5, 4  ;;  %s1154_s18 = int_to_ptr.vmem [resolvable:$true] %s1153_s18 }
 0x1fb   :  { %v657_v31 = vadd.f32 %v1796_v15, %v632_v20  ;;  %v624_v32 = vadd.f32 %v623_v27, %v478_v24  ;;  %1465 = vmatprep.mubr.bf16.mxu0 %v678_v23  ;;  %v670_v36 = vmax.f32 %v654_v30, 0.0  ;;  %s1642_s19 = scalar_lea.vmem %s1154_s18, 2048  ;;  %p1647_p7 = scmp.lt.s32.totalorder %s1154_s18, %s1154_s18 }
 0x1fc   :  { %1466 = vmatmul.mubr.bf16.gmra.mxu0 %v679_v29  ;;  %p1643_p6 = scmp.ne.s32.totalorder %s1154_s18, %s1642_s19  ;;  %p1648_p8 = scmp.lt.s32.totalorder %s1642_s19, %s1642_s19 }
 0x1fd   :  { %v673_v34 = vmax.f32 %v657_v31, 0.0  ;;  %v655_v35 = vadd.f32 %v1796_v15, %v624_v32  ;;  %v1554_v15 = vld [vmem:[#allocation8 + $0x38] sm:$0xff]  }
 0x1fe   :  { %p1649_p9 = por %p1648_p8, %p1647_p7 }
 0x1ff   :  { %v671_v37 = vmax.f32 %v655_v35, 0.0  ;;  %v681_v38 = vpack.c.bf16 %v673_v34, %v672_v33 }
 0x200   :  { %p1650_p10 = pnand %p1649_p9, %p1643_p6 }
 0x201   :  { %1409 = vmatprep.subr.bf16.mxu1 %v681_v38  ;;  %v680_v39 = vpack.c.bf16 %v671_v37, %v670_v36 }
 0x202   :  { %1410 = vmatpush3.bf16.msra.mxu1 %v681_v38 }
 0x203   :  { %1411 = vmatprep.subr.bf16.mxu1 %v680_v39  ;;  %1469 = vmatprep.mubr.bf16.mxu0 %v680_v39 }
 0x204   :  { %1470 = vmatmul.mubr.bf16.gmra.mxu0 %v681_v38 }
 0x206   :  { %1412 = vmatpush3.bf16.msra.mxu1 %v680_v39 }
 0x207   :  { %1413 = vmatprep.subr.bf16.mxu1 %v679_v29 }
 0x20a   :  { %1414 = vmatpush3.bf16.msra.mxu1 %v679_v29 }
 0x20b   :  { %1415 = vmatprep.subr.bf16.mxu1 %v678_v23 }
 0x20e   :  { %1416 = vmatpush3.bf16.msra.mxu1 %v678_v23 }
 0x20f   :  { %1417 = vmatprep.subr.bf16.mxu1 %v677_v0 }
 0x212   :  { %1418 = vmatpush3.bf16.msra.mxu1 %v677_v0 }
 0x213   :  { %1419 = vmatprep.subr.bf16.mxu1 %v676_v61 }
 0x216   :  { %1420 = vmatpush3.bf16.msra.mxu1 %v676_v61 }
 0x217   :  { %1421 = vmatprep.subr.bf16.mxu1 %v1804_v42 }
 0x21a   :  { %1422 = vmatpush3.bf16.msra.mxu1 %v1804_v42 }
 0x21b   :  { %1423 = vmatprep.subr.bf16.mxu1 %v1802_v41 }
 0x21e   :  { %1424 = vmatpush3.bf16.msra.mxu1 %v1802_v41  ;;  %v1556_v41 = vld [vmem:[#allocation8 + $0x28] sm:$0xff]  }
 0x21f   :  { %1473 = vmatprep.subr.bf16.mxu1 %v1554_v15 }
 0x221   :  { %1426 = vmatmul.mubr.bf16.vlgmr.msra.gmra.mxu1 %v1765_v14  ;;  %v1557_v14 = vld [vmem:[#allocation8 + $0x20] sm:$0xff]  }
 0x222   :  { %1429 = vmatprep.mubr.bf16.mxu1 %v1767_v16  ;;  %1474 = vmatpush3.bf16.msra.mxu1 %v1554_v15  ;;  %v1558_v16 = vld [vmem:[#allocation8 + $0x18] sm:$0xff]  }
 0x223   :  { %1475 = vmatprep.subr.bf16.mxu1 %v1555_v40 }
 0x226   :  { %1476 = vmatpush3.bf16.msra.mxu1 %v1555_v40 }
 0x227   :  { %1477 = vmatprep.subr.bf16.mxu1 %v1556_v41 }
 0x229   :  { %1430 = vmatmul.mubr.bf16.gmra.mxu1 %v1771_v21  ;;  %v1559_v21 = vld [vmem:[#allocation8 + $0x10] sm:$0xff]  }
 0x22a   :  { %1433 = vmatprep.mubr.bf16.mxu1 %v1773_v22  ;;  %1478 = vmatpush3.bf16.msra.mxu1 %v1556_v41  ;;  %v1560_v22 = vld [vmem:[#allocation8 + $0x8] sm:$0xff]  }
 0x22b   :  { %1479 = vmatprep.subr.bf16.mxu1 %v1557_v14 }
 0x22e   :  { %1480 = vmatpush3.bf16.msra.mxu1 %v1557_v14 }
 0x22f   :  { %1481 = vmatprep.subr.bf16.mxu1 %v1558_v16 }
 0x231   :  { %1434 = vmatmul.mubr.bf16.gmra.mxu1 %v1777_v25  ;;  %v1561_v25 = vld [vmem:[#allocation8] sm:$0xff]  }
 0x232   :  { %1437 = vmatprep.mubr.bf16.mxu1 %v1779_v26  ;;  %1482 = vmatpush3.bf16.msra.mxu1 %v1558_v16 }
 0x233   :  { %1483 = vmatprep.subr.bf16.mxu1 %v1559_v21 }
 0x236   :  { %1484 = vmatpush3.bf16.msra.mxu1 %v1559_v21 }
 0x237   :  { %1485 = vmatprep.subr.bf16.mxu1 %v1560_v22 }
 0x239   :  { %1438 = vmatmul.mubr.bf16.gmra.mxu1 %v1783_v28 }
 0x23a   :  { %1486 = vmatpush3.bf16.msra.mxu1 %v1560_v22 }
 0x23b   :  { %1487 = vmatprep.subr.bf16.mxu1 %v1561_v25 }
 0x23e   :  { %1488 = vmatpush3.bf16.msra.mxu1 %v1561_v25 }
 0x2ac   :  { %v1459_v0 = vpop.f32.mrf.mxu0 }
 0x2ae   :  { %v901_v1 = vpop.f32.mrf.mxu0 }
 0x2b0   :  { %v1460_v2 = vpop.f32.mrf.mxu0 }
 0x2b2   :  { %v904_v3 = vpop.f32.mrf.mxu0 }
 0x2b4   :  { %v1463_v4 = vpop.f32.mrf.mxu0 }
 0x2b6   :  { %v917_v5 = vpop.f32.mrf.mxu0 }
 0x2b8   :  { %v1464_v6 = vpop.f32.mrf.mxu0 }
 0x2ba   :  { %v920_v7 = vpop.f32.mrf.mxu0 }
 0x2bc   :  { %v1467_v11 = vpop.f32.mrf.mxu0 }
 0x2be   :  { %v933_v23 = vpop.f32.mrf.mxu0 }
 0x2c0   :  { %v1468_v33 = vpop.f32.mrf.mxu0 }
 0x2c2   :  { %v936_v15 = vpop.f32.mrf.mxu0 }
 0x2c4   :  { %v1471_v25 = vpop.f32.mrf.mxu0 }
 0x2e1   :  { %v1427_v26 = vpop.f32.mrf.mxu1 }
 0x2e3   :  { %v716_v28 = vpop.f32.mrf.mxu1 }
 0x2e5   :  { %v1428_v42 = vpop.f32.mrf.mxu1 }
 0x2e6   :  { %v780_v45 = vpack.c.bf16 %v1428_v42, %v1427_v26 }
 0x2e7   :  { %v719_v43 = vpop.f32.mrf.mxu1 }
 0x2e8   :  { %v779_v44 = vpack.c.bf16 %v719_v43, %v716_v28 }
 0x2e9   :  { %v1431_v46 = vpop.f32.mrf.mxu1 }
 0x2ea   :  { %1489 = vmatprep.mubr.bf16.mxu1 %v779_v44 }
 0x2eb   :  { %v732_v47 = vpop.f32.mrf.mxu1  ;;  %1490 = vmatmul.mubr.bf16.vlgmr.msra.gmra.mxu1 %v780_v45 }
 0x2ed   :  { %v1432_v48 = vpop.f32.mrf.mxu1 }
 0x2ee   :  { %v782_v51 = vpack.c.bf16 %v1432_v48, %v1431_v46  ;;  %v949_v46 = vpop.f32.mrf.mxu0 }
 0x2ef   :  { %v735_v49 = vpop.f32.mrf.mxu1 }
 0x2f0   :  { %v781_v50 = vpack.c.bf16 %v735_v49, %v732_v47 }
 0x2f1   :  { %v1435_v52 = vpop.f32.mrf.mxu1 }
 0x2f2   :  { %1493 = vmatprep.mubr.bf16.mxu1 %v781_v50 }
 0x2f3   :  { %v748_v53 = vpop.f32.mrf.mxu1  ;;  %1494 = vmatmul.mubr.bf16.gmra.mxu1 %v782_v51 }
 0x2f5   :  { %v1436_v54 = vpop.f32.mrf.mxu1 }
 0x2f6   :  { %v784_v57 = vpack.c.bf16 %v1436_v54, %v1435_v52 }
 0x2f7   :  { %v751_v55 = vpop.f32.mrf.mxu1 }
 0x2f8   :  { %v783_v56 = vpack.c.bf16 %v751_v55, %v748_v53  ;;  %v1472_v53 = vpop.f32.mrf.mxu0 }
 0x2f9   :  { %v1439_v58 = vpop.f32.mrf.mxu1 }
 0x2fa   :  { %1497 = vmatprep.mubr.bf16.mxu1 %v783_v56 }
 0x2fb   :  { %v764_v59 = vpop.f32.mrf.mxu1  ;;  %1498 = vmatmul.mubr.bf16.gmra.mxu1 %v784_v57 }
 0x2fd   :  { %v1440_v60 = vpop.f32.mrf.mxu1 }
 0x2fe   :  { %v786_v63 = vpack.c.bf16 %v1440_v60, %v1439_v58  ;;  %v952_v60 = vpop.f32.mrf.mxu0 }
 0x2ff   :  { %v767_v61 = vpop.f32.mrf.mxu1 }
 0x300   :  { %v785_v62 = vpack.c.bf16 %v767_v61, %v764_v59 }
 0x302   :  { %1501 = vmatprep.mubr.bf16.mxu1 %v785_v62 }
 0x303   :  { %1502 = vmatmul.mubr.bf16.gmra.mxu1 %v786_v63 }
 0x3ab   :  { %v1491_v8 = vpop.f32.mrf.mxu1 }
 0x3ac   :  { %v1055_v10 = vadd.f32 %v1491_v8, %v1459_v0 }
 0x3ad   :  { %v1046_v12 = vpop.f32.mrf.mxu1 }
 0x3ae   :  { %v1118_v13 = vadd.f32 %v1834_v9, %v1055_v10  ;;  %v1047_v17 = vadd.f32 %v1046_v12, %v901_v1 }
 0x3af   :  { %v1492_v18 = vpop.f32.mrf.mxu1 }
 0x3b0   :  { %1134 = vst [vmem:[#allocation10 + $0x10] sm:$0xff] %v1118_v13  ;;  %v1116_v19 = vadd.f32 %v1834_v9, %v1047_v17  ;;  %v1058_v20 = vadd.f32 %v1492_v18, %v1460_v2 }
 0x3b1   :  { %v1049_v24 = vpop.f32.mrf.mxu1 }
 0x3b2   :  { %1132 = vst [vmem:[#allocation10] sm:$0xff] %v1116_v19  ;;  %v1119_v27 = vadd.f32 %v1834_v9, %v1058_v20  ;;  %v1050_v29 = vadd.f32 %v1049_v24, %v904_v3 }
 0x3b3   :  { %v1495_v30 = vpop.f32.mrf.mxu1 }
 0x3b4   :  { %1135 = vst [vmem:[#allocation10 + $0x18] sm:$0xff] %v1119_v27  ;;  %v1117_v31 = vadd.f32 %v1834_v9, %v1050_v29  ;;  %v1071_v32 = vadd.f32 %v1495_v30, %v1463_v4 }
 0x3b5   :  { %v1062_v34 = vpop.f32.mrf.mxu1 }
 0x3b6   :  { %1133 = vst [vmem:[#allocation10 + $0x8] sm:$0xff] %v1117_v31  ;;  %v1122_v35 = vadd.f32 %v1834_v9, %v1071_v32  ;;  %v1063_v36 = vadd.f32 %v1062_v34, %v917_v5 }
 0x3b7   :  { %v1496_v37 = vpop.f32.mrf.mxu1 }
 0x3b8   :  { %1138 = vst [vmem:[#allocation10 + $0x30] sm:$0xff] %v1122_v35  ;;  %v1120_v38 = vadd.f32 %v1834_v9, %v1063_v36  ;;  %v1074_v39 = vadd.f32 %v1496_v37, %v1464_v6 }
 0x3b9   :  { %v1065_v40 = vpop.f32.mrf.mxu1 }
 0x3ba   :  { %1136 = vst [vmem:[#allocation10 + $0x20] sm:$0xff] %v1120_v38  ;;  %v1123_v41 = vadd.f32 %v1834_v9, %v1074_v39  ;;  %v1066_v14 = vadd.f32 %v1065_v40, %v920_v7 }
 0x3bb   :  { %v1499_v16 = vpop.f32.mrf.mxu1 }
 0x3bc   :  { %1139 = vst [vmem:[#allocation10 + $0x38] sm:$0xff] %v1123_v41  ;;  %v1121_v21 = vadd.f32 %v1834_v9, %v1066_v14  ;;  %v1087_v22 = vadd.f32 %v1499_v16, %v1467_v11 }
 0x3bd   :  { %v1078_v26 = vpop.f32.mrf.mxu1 }
 0x3be   :  { %1137 = vst [vmem:[#allocation10 + $0x28] sm:$0xff] %v1121_v21  ;;  %v1126_v28 = vadd.f32 %v1834_v9, %v1087_v22  ;;  %v1079_v42 = vadd.f32 %v1078_v26, %v933_v23 }
 0x3bf   :  { %v1500_v43 = vpop.f32.mrf.mxu1 }
 0x3c0   :  { %1142 = vst [vmem:[#allocation10 + $0x50] sm:$0xff] %v1126_v28  ;;  %v1124_v44 = vadd.f32 %v1834_v9, %v1079_v42  ;;  %v1090_v45 = vadd.f32 %v1500_v43, %v1468_v33 }
 0x3c1   :  { %v1081_v47 = vpop.f32.mrf.mxu1 }
 0x3c2   :  { %1140 = vst [vmem:[#allocation10 + $0x40] sm:$0xff] %v1124_v44  ;;  %v1127_v48 = vadd.f32 %v1834_v9, %v1090_v45  ;;  %v1082_v49 = vadd.f32 %v1081_v47, %v936_v15 }
 0x3c3   :  { %v1503_v50 = vpop.f32.mrf.mxu1 }
 0x3c4   :  { %1143 = vst [vmem:[#allocation10 + $0x58] sm:$0xff] %v1127_v48  ;;  %v1125_v51 = vadd.f32 %v1834_v9, %v1082_v49  ;;  %v1103_v52 = vadd.f32 %v1503_v50, %v1471_v25 }
 0x3c5   :  { %v1094_v54 = vpop.f32.mrf.mxu1 }
 0x3c6   :  { %1141 = vst [vmem:[#allocation10 + $0x48] sm:$0xff] %v1125_v51  ;;  %v1130_v55 = vadd.f32 %v1834_v9, %v1103_v52  ;;  %v1095_v56 = vadd.f32 %v1094_v54, %v949_v46 }
 0x3c7   :  { %v1504_v57 = vpop.f32.mrf.mxu1 }
 0x3c8   :  { %1146 = vst [vmem:[#allocation10 + $0x70] sm:$0xff] %v1130_v55  ;;  %v1128_v58 = vadd.f32 %v1834_v9, %v1095_v56  ;;  %v1106_v59 = vadd.f32 %v1504_v57, %v1472_v53 }
 0x3c9   :  { %v1097_v61 = vpop.f32.mrf.mxu1 }
 0x3ca   :  { %1144 = vst [vmem:[#allocation10 + $0x60] sm:$0xff] %v1128_v58  ;;  %v1131_v62 = vadd.f32 %v1834_v9, %v1106_v59  ;;  %v1098_v63 = vadd.f32 %v1097_v61, %v952_v60 }
 0x3cc   :  { %1147 = vst [vmem:[#allocation10 + $0x78] sm:$0xff] %v1131_v62  ;;  %v1129_v0 = vadd.f32 %v1834_v9, %v1098_v63 }
 0x3ce   :  { %1145 = vst [vmem:[#allocation10 + $0x68] sm:$0xff] %v1129_v0 }
 0x3cf   :  { %1653 = shalt.err (!%p1650_p10)
}
 0x3d0   :  { %s1677_s20 = smov 128   ;;  %s1678_s21 = smov 8  }
 0x3d1   :  { %1159 = dma.vmem_to_hbm [thread:$0]  %s1154_s18, 2048, %s1861_s6, [#allocation4], %s1677_s20, %s1677_s20, %s1678_s21  }
 0x3d2   :  { %1668 = dma.done.wait [#allocation4], 2048  }
 0x3d3   :  { %1669 = vsyncadd [#allocation4], 4294965248 }
 0x3d4   :  { %1163 = vsyncpa [#allocation3], 1 }
 0x3d5   :  { %1164 = vsyncpa [#allocation6], 1 }
 0x3d6   :  { %1165 = vsyncpa [#allocation9], 1 }
 0x3d7   :  { %1166 = vsyncpa [#allocation4], 1 }

</bundles_post_ra>
